<compile_context>
chip_gen: v6e
topology: v6e:2x2x1
jax: 0.10.0
libtpu: 0.0.40
codegen_flags: <defaults>
</compile_context>

<pallas_src>
from functools import partial

import numpy as np
import jax
import jax.numpy as jnp
from jax.experimental import pallas as pl
from jax.experimental.pallas import tpu as pltpu

_LANE = 128


def _round_up(n, m):
    return ((n + m - 1) // m) * m


def _target_block_bytes():
    """Per-generation block-size target (keeps live VMEM inside scoped defaults)."""
    try:
        kind = jax.devices()[0].device_kind.lower()
    except Exception:
        kind = ""
    if ("v6" in kind) or ("v7" in kind) or ("tpu7" in kind):
        # v6e / v7x: 32 MiB scoped-VMEM default -> 4 MiB blocks, ~16 MiB live.
        return 4 << 20
    # v5e and older: 16 MiB scoped default; 1 MiB already hides per-step overhead.
    return 1 << 20


def drop_path_kernel(mask_ref, x_ref, o_ref, *, inv_keep_prob):
    """mask_ref: (B,) int32 in SMEM (scalar prefetch).  x_ref/o_ref: one block."""
    keep = mask_ref[pl.program_id(0)]

    @pl.when(keep == 0)
    def _():
        # Dropped sample: exact zeros (input block was re-pointed / not fetched).
        o_ref[...] = jnp.zeros_like(o_ref)

    @pl.when(keep != 0)
    def _():
        # Kept sample: multiply in the input dtype (scalar cast once, no tile promote).
        scale = jnp.asarray(inv_keep_prob, dtype=x_ref.dtype)
        o_ref[...] = (x_ref[...] * scale).astype(o_ref.dtype)


def _tiled_call(x3, keep_mask, kernel, r_tile):
    """x3: (B, R, 128).  Grid (B, cdiv(R, r_tile)); ragged last row-block is masked."""
    B, R, _ = x3.shape
    return pl.pallas_call(
        kernel,
        out_shape=jax.ShapeDtypeStruct((B, R, _LANE), x3.dtype),
        grid_spec=pltpu.PrefetchScalarGridSpec(
            num_scalar_prefetch=1,  # keep_mask -> SMEM
            grid=(B, pl.cdiv(R, r_tile)),
            in_specs=[
                # Dropped samples (m[b]==0) are re-pointed at block (0,0,0) so the
                # pipeline reuses the resident buffer and skips the HBM fetch.
                pl.BlockSpec((1, r_tile, _LANE),
                             lambda b, r, m: (b * m[b], r * m[b], 0)),
            ],
            out_specs=pl.BlockSpec((1, r_tile, _LANE), lambda b, r, m: (b, r, 0)),
        ),
        compiler_params=pltpu.CompilerParams(
            # Both axes independent -> v7x can shard the grid over its 2 TensorCores.
            dimension_semantics=("parallel", "parallel"),
        ),
    )(keep_mask, x3)


def drop_path(x, drop_prob, training, key):
    """JAX/Pallas equivalent of DropPath.forward(x). drop_prob/training must be static."""
    if drop_prob is None or float(drop_prob) == 0.0 or not training:
        return x
    drop_prob = float(drop_prob)
    if drop_prob >= 1.0:
        return jnp.zeros_like(x)

    keep_prob = 1.0 - drop_prob
    inv_keep_prob = 1.0 / keep_prob

    B = x.shape[0]
    F = int(np.prod(x.shape[1:]))

    # Per-sample Bernoulli(keep_prob) mask drawn in float32 (exact keep prob even
    # for bf16/fp16 inputs), stored as 0/1 int32 for SMEM scalar prefetch.
    u = jax.random.uniform(key, (B,), dtype=jnp.float32)
    keep_mask = jnp.floor(keep_prob + u).astype(jnp.int32)  # (B,) of 0/1

    itemsize = jnp.dtype(x.dtype).itemsize
    sublane = max(8, 32 // itemsize)          # 8 (f32) / 16 (bf16) / 32 (int8, fp8)
    target = _target_block_bytes()
    kernel = partial(drop_path_kernel, inv_keep_prob=inv_keep_prob)

    # ---------- Main path: F divisible by 128 -> zero-copy lane-dense tiling ----------
    if F % _LANE == 0:
        R = F // _LANE
        rows_per_block = max(sublane,
                             (target // (_LANE * itemsize)) // sublane * sublane)
        r_tile = min(_round_up(R, sublane), rows_per_block)
        out = _tiled_call(x.reshape(B, R, _LANE), keep_mask, kernel, r_tile)
        return out.reshape(x.shape)

    # ---------- F not a multiple of 128 ----------
    # Whole-sample (1,1,F) block (dims equal the full array dims -> legal layout,
    # lane tail handled by masked stores).  VMEM footprint per block is
    # ~round_up(F,128) * 32 bytes because the single row pads to a full sublane tile.
    whole_sample_vmem = _round_up(F, _LANE) * 32
    if whole_sample_vmem <= target:
        x3 = x.reshape(B, 1, F)
        out = pl.pallas_call(
            kernel,
            out_shape=jax.ShapeDtypeStruct((B, 1, F), x.dtype),
            grid_spec=pltpu.PrefetchScalarGridSpec(
                num_scalar_prefetch=1,
                grid=(B,),
                in_specs=[pl.BlockSpec((1, 1, F), lambda b, m: (b * m[b], 0, 0))],
                out_specs=pl.BlockSpec((1, 1, F), lambda b, m: (b, 0, 0)),
            ),
            compiler_params=pltpu.CompilerParams(
                dimension_semantics=("parallel",),
            ),
        )(keep_mask, x3)
        return out.reshape(x.shape)

    # Fallback for very large F that is not a multiple of 128: pad the lane tail.
    # TODO(synk): the jnp.pad + slice-back here are two extra full-tensor HBM copies;
    # a manual-DMA (memory_space=pl.ANY) tail handler would remove them.
    f_pad = _round_up(F, _LANE)
    R = f_pad // _LANE
    rows_per_block = max(sublane, (target // (_LANE * itemsize)) // sublane * sublane)
    r_tile = min(_round_up(R, sublane), rows_per_block)
    x2 = jnp.pad(x.reshape(B, F), ((0, 0), (0, f_pad - F)))
    out = _tiled_call(x2.reshape(B, R, _LANE), keep_mask, kernel, r_tile)
    return out.reshape(B, f_pad)[:, :F].reshape(x.shape)


class DropPath:
    """Stateless JAX port of the PyTorch DropPath module."""

    def __init__(self, drop_prob=None):
        self.drop_prob = drop_prob
        self.training = True

    def __call__(self, x, key):
        return drop_path(x, self.drop_prob, self.training, key)


if __name__ == "__main__":
    key = jax.random.PRNGKey(0)
    kx1, km1, kx2, km2, kx3, km3 = jax.random.split(key, 6)

    # --- Case 1: NCHW f32, F = 4*16*16 = 1024 (multiple of 128) -> tiled path ---
    x1 = jax.random.normal(kx1, (2, 4, 16, 16), dtype=jnp.float32)
    module = DropPath(drop_prob=0.2)
    module.training = True
    out1 = jax.block_until_ready(module(x1, km1))

    kp1 = 0.8
    u1 = jax.random.uniform(km1, (2,), dtype=jnp.float32)
    mask1 = jnp.floor(kp1 + u1).reshape(2, 1, 1, 1)
    ref1 = x1 / kp1 * mask1
    np.testing.assert_allclose(np.asarray(out1), np.asarray(ref1), rtol=1e-5, atol=1e-6)

    # --- Case 2: F = 300 (not a multiple of 128) -> whole-sample path, no pad/slice ---
    x2 = jax.random.normal(kx2, (3, 3, 10, 10), dtype=jnp.float32)
    out2 = jax.block_until_ready(drop_path(x2, 0.3, True, km2))
    kp2 = 0.7
    u2 = jax.random.uniform(km2, (3,), dtype=jnp.float32)
    mask2 = jnp.floor(kp2 + u2).reshape(3, 1, 1, 1)
    ref2 = x2 / kp2 * mask2
    np.testing.assert_allclose(np.asarray(out2), np.asarray(ref2), rtol=1e-5, atol=1e-6)

    # --- Case 3: bf16 input -> dtype-aware sublane (16) + in-dtype multiply ---
    x3 = jax.random.normal(kx3, (2, 8, 16, 16), dtype=jnp.bfloat16)
    out3 = jax.block_until_ready(drop_path(x3, 0.25, True, km3))
    kp3 = 0.75
    u3 = jax.random.uniform(km3, (2,), dtype=jnp.float32)
    mask3 = jnp.floor(kp3 + u3).reshape(2, 1, 1, 1)
    ref3 = jnp.where(mask3 > 0,
                     x3 * jnp.asarray(1.0 / kp3, jnp.bfloat16),
                     jnp.zeros_like(x3))
    np.testing.assert_allclose(np.asarray(out3.astype(jnp.float32)),
                               np.asarray(ref3.astype(jnp.float32)),
                               rtol=2e-2, atol=1e-2)

    # --- Eval mode: identity ---
    module.training = False
    out_eval = jax.block_until_ready(module(x1, km1))
    np.testing.assert_array_equal(np.asarray(out_eval), np.asarray(x1))

    print("KERNEL_OK")
</pallas_src>

<mosaic_0001>
module attributes {stable_mosaic.version = 11 : i64} {
  func.func @drop_path_kernel(%arg0: i32, %arg1: i32, %arg2: memref<2xi32, #tpu.memory_space<smem>>, %arg3: memref<1x8x128xf32, #tpu.memory_space<vmem>>, %arg4: memref<1x8x128xf32, #tpu.memory_space<vmem>>) attributes {dimension_semantics = [#tpu.dimension_semantics<parallel>, #tpu.dimension_semantics<parallel>], iteration_bounds = array<i64: 2, 1>, scalar_prefetch = 1 : i64, scratch_operands = 0 : i64, tpu.core_type = #tpu.core_type<tc>, window_params = [{transform_indices = @transform_0, window_bounds = array<i64: 1, 8, 128>}, {transform_indices = @transform_1, window_bounds = array<i64: 1, 8, 128>}]} {
    %0 = arith.index_cast %arg0 : i32 to index
    %1 = memref.load %arg2[%0] : memref<2xi32, #tpu.memory_space<smem>>
    %c0_i32 = arith.constant 0 : i32
    %2 = arith.cmpi eq, %1, %c0_i32 : i32
    %3 = arith.extui %2 : i1 to i32
    %c0_i32_0 = arith.constant 0 : i32
    %4 = arith.cmpi ne, %3, %c0_i32_0 : i32
    scf.if %4 {
      %cst = arith.constant 0.000000e+00 : f32
      %8 = vector.broadcast %cst : f32 to vector<1x8x128xf32>
      %c0 = arith.constant 0 : index
      %c0_3 = arith.constant 0 : index
      %c0_4 = arith.constant 0 : index
      %9 = vector.load %arg4[%c0, %c0_3, %c0_4] : memref<1x8x128xf32, #tpu.memory_space<vmem>>, vector<1x8x128xf32>
      tpu.vector_store %arg4[%c0, %c0_3, %c0_4], %8 {strides = array<i32>} : memref<1x8x128xf32, #tpu.memory_space<vmem>>, vector<1x8x128xf32>,
    } else {
    }
    %c0_i32_1 = arith.constant 0 : i32
    %5 = arith.cmpi ne, %1, %c0_i32_1 : i32
    %6 = arith.extui %5 : i1 to i32
    %c0_i32_2 = arith.constant 0 : i32
    %7 = arith.cmpi ne, %6, %c0_i32_2 : i32
    scf.if %7 {
      %c0 = arith.constant 0 : index
      %c0_3 = arith.constant 0 : index
      %c0_4 = arith.constant 0 : index
      %8 = vector.load %arg3[%c0, %c0_3, %c0_4] : memref<1x8x128xf32, #tpu.memory_space<vmem>>, vector<1x8x128xf32>
      %cst = arith.constant 1.250000e+00 : f32
      %9 = vector.broadcast %cst : f32 to vector<1x8x128xf32>
      %10 = arith.mulf %8, %9 : vector<1x8x128xf32>
      %c0_5 = arith.constant 0 : index
      %c0_6 = arith.constant 0 : index
      %c0_7 = arith.constant 0 : index
      %11 = vector.load %arg4[%c0_5, %c0_6, %c0_7] : memref<1x8x128xf32, #tpu.memory_space<vmem>>, vector<1x8x128xf32>
      tpu.vector_store %arg4[%c0_5, %c0_6, %c0_7], %10 {strides = array<i32>} : memref<1x8x128xf32, #tpu.memory_space<vmem>>, vector<1x8x128xf32>,
    } else {
    }
    return
  }
  func.func @transform_0(%arg0: i32, %arg1: i32, %arg2: memref<2xi32, #tpu.memory_space<smem>>) -> (i32, i32, i32) {
    %0 = arith.index_cast %arg0 : i32 to index
    %1 = memref.load %arg2[%0] : memref<2xi32, #tpu.memory_space<smem>>
    %2 = arith.muli %arg0, %1 : i32
    %3 = arith.index_cast %arg0 : i32 to index
    %4 = memref.load %arg2[%3] : memref<2xi32, #tpu.memory_space<smem>>
    %5 = arith.muli %arg1, %4 : i32
    %c0_i32 = arith.constant 0 : i32
    %c0_i32_0 = arith.constant 0 : i32
    return %2, %5, %c0_i32 : i32, i32, i32
  }
  func.func @transform_1(%arg0: i32, %arg1: i32, %arg2: memref<2xi32, #tpu.memory_space<smem>>) -> (i32, i32, i32) {
    %c0_i32 = arith.constant 0 : i32
    %c0_i32_0 = arith.constant 0 : i32
    return %arg0, %arg1, %c0_i32 : i32, i32, i32
  }
}

</mosaic_0001>

<bundles_post_ra>
// kernel: tpu_custom_call.1
= control target key start
LH: loop header
LB: loop body
LE: loop exit
PB: predicated region body
PF: predicated region fallthrough
CT: control target
= control target key end

     0   :  { %s525_s9 = smov [#allocation3]   ;;  %s725_s0 = inlined_call_operand.hbm [shape: s32[2], index: 0, kind: input, shape index: {}]   ;;  %s726_s1 = inlined_call_operand.hbm [shape: f32[2,8,128], index: 1, kind: input, shape index: {}]   ;;  %s727_s2 = inlined_call_operand.hbm [shape: f32[2,8,128], index: 2, kind: output, shape index: {}]  }
   0x1   :  { %8 = dma.hbm_to_smem %s725_s0, 16, %s525_s9, [#allocation2] }
   0x2   :  { %479 = dma.done.wait [#allocation2], 16 }
   0x3   :  { %480 = vsyncadd [#allocation2], 4294967280 }
   0x4   :  { %10 = sfence }
   0x5   :  { %11 = vsyncpa [#allocation5], 0 }
   0x6   :  { %13 = vsyncpa [#allocation5 + $0x1], 0 }
   0x7   :  { %14 = vsyncpa [#allocation6], 0 }
   0x8   :  { %16 = vsyncpa [#allocation6 + $0x1], 0  ;;  %s547_s12 = smov 0   ;;  %s549_s13 = smov 0  }
   0x9   :  { %s551_s14 = smov 0   ;;  %s553_s15 = smov 0  }
   0xa   :  { %s555_s16 = smov 0   ;;  %s557_s17 = smov 0  }
   0xb   :  { %s559_s0 = smov 0   ;;  %s561_s18 = smov 0  }
   0xc   :  { %s563_s19 = smov 0  }
   0xd LB: > { %s274_s20 = sadd.s32 4294967295, %s523_s19   ;;  %s34_s21 = sadd.s32 1, %s519_s18  ;;  %s523_s19 = sphi %s563_s19, %s22_s19   ;;  %s519_s18 = sphi %s561_s18, %s750_s18   ;;  %s515_s0 = sphi %s559_s0, %s749_s0   ;;  %s511_s17 = sphi %s557_s17, %s748_s17   ;;  %s507_s16 = sphi %s555_s16, %s747_s16   ;;  %s503_s15 = sphi %s553_s15, %s746_s15   ;;  %s499_s14 = sphi %s551_s14, %s745_s14   ;;  %s495_s13 = sphi %s549_s13, %s744_s13   ;;  %s491_s12 = sphi %s547_s12, %s743_s12  }
   0xe   : > { %s38_s22 = sld [smem:[#allocation3 + %s519_s18]]  ;;  %s275_s23 = sadd.s32 4294967294, %s523_s19  }
   0xf   : > { %p36_p0 = scmp.ge.s32.totalorder %s34_s21, 2  ;;  %s49_s24 = sadd.s32 1, %s511_s17 }
  0x10   : > { %p56_p1 = scmp.ne.s32.totalorder %s511_s17, %s507_s16  ;;  %p57_p2 = scmp.eq.s32.totalorder %s523_s19, 0 }
  0x11   : > { %s752_s21 = smov (%p36_p0, %s34_s21), 0  ;;  %p62_p3 = scmp.ne.s32.totalorder %s507_s16, %s503_s15 }
  0x12   : > { %731 = sst [smem:[#allocation13_spill]] %s752_s21  ;;  %p63_p4 = scmp.eq.s32.totalorder %s274_s20, 0 }
  0x13   : > { %s41_s25 = sld [smem:[#allocation3 + %s752_s21]]  ;;  %s72_s27 = ssub.s32 %s519_s18, %s752_s21 }
  0x14   : > { %s39_s26 = smul.u32 %s519_s18, %s38_s22  ;;  %p605_p5 = por %p63_p4, %p62_p3 }
  0x15   : > { %p75_p6 = scmp.eq.s32.totalorder %s72_s27, 0  ;;  %s77_s29 = sadd.s32 1, %s499_s14 }
  0x16   : > { %s732_s28 = scalar_select %p605_p5, 1, 0 }
  0x17   : > { %p87_p7 = scmp.ne.s32.totalorder %s499_s14, %s495_s13  ;;  %p88_p8 = scmp.eq.s32.totalorder %s274_s20, 1 }
  0x18   : > { %s613_s30 = scalar_select %p75_p6, %s499_s14, %s77_s29  }
  0x19   : > { %p93_p9 = scmp.ne.s32.totalorder %s495_s13, %s491_s12  ;;  %s42_s3 = smul.u32 %s41_s25, %s752_s21 }
  0x1a   : > { %p94_p10 = scmp.eq.s32.totalorder %s275_s23, 1  ;;  %p618_p11 = por %p88_p8, %p87_p7 }
  0x1b   : > { %s44_s5 = ssub.s32 %s39_s26, %s42_s3  ;;  %p58_p3 = por %p57_p2, %p56_p1 }
  0x1c   : > { %s733_s4 = scalar_select %p618_p11, 1, 0 }
  0x1d   : > { %p623_p13 = por %p94_p10, %p93_p9  ;;  %p47_p0 = scmp.eq.s32.totalorder %s44_s5, 0 }
  0x1e   : > { %p305_p4 = scmp.lt.s32.totalorder %s523_s19, 2  ;;  %s114_s7 = sand.u32 1, %s511_s17  }
  0x1f   : > { %s734_s6 = scalar_select %p623_p13, 1, 0 }
  0x20   : > { %s635_s8 = scalar_select %p47_p0, %s511_s17, %s49_s24  }
  0x21   : > { %s278_s9 = sshll.u32 %s114_s7, 3  ;;  %p637_p6 = pnand %p305_p4, %p58_p3 }
  0x22   : > { %s289_s11 = scalar_select %p58_p3, [#allocation3], [#allocation8] }
  0x23   : > { %s290_s15 = scalar_select %p58_p3, %s519_s18, 0 }
  0x24   : > { %s754_s11 = smov (!%p305_p4, %s289_s11), [#allocation9]  ;;  %p280_p7 = scmp.ge.s32.totalorder %s523_s19, 1 }
  0x25   : > { %s756_s15 = smov (!%p305_p4, %s290_s15), 0  ;;  %p134_p8 = scmp.lt.s32.totalorder %s523_s19, 3 }
  0x26   : > { %s119_s20 = sld [smem:[%s754_s11 + %s756_s15]]  ;;  %s118_s23 = scalar_lea.vmem [#allocation4], %s278_s9 }
  0x27   : > { %p644_p9 = pnand %p280_p7, %p134_p8  ;;  %s129_s24 = sshll.u32 %s118_s23, 4  ;;  %s649_s24 = int_to_ptr.vmem [resolvable:$true] %s129_s24 }
  0x28   : > { %s115_s5 = scalar_lea.sflag [#allocation5], %s114_s7  ;;  %p391_p2 = pneg %p637_p6 }
  0x29   : > { %s736_s22 = scalar_select %p644_p9, 1, 0 }
  0x2a   : > { %s394_s9 = scalar_lea.hbm %s726_s1, 256 }
  0x2c   : > { %s120_s25 = smul.u32 %s519_s18, %s119_s20 }
  0x2e   : > { %s279_s26 = sshll.u32 %s120_s25, 7 }
  0x2f   : > { %s127_s3 = scalar_lea.hbm %s726_s1, %s279_s26 }
  0x30   : > { %s389_s21 = scalar_lea.hbm %s127_s3, 128  ;;  %p395_p3 = scmp.lt.s32.totalorder %s127_s3, %s726_s1 }
  0x31   : > { %p390_p1 = scmp.ne.s32.totalorder %s127_s3, %s389_s21  ;;  %p396_p4 = scmp.lt.s32.totalorder %s394_s9, %s389_s21 }
  0x33   : > { %p392_p10 = pnand %p391_p2, %p390_p1  ;;  %p397_p7 = por %p396_p4, %p395_p3 }
  0x35   : > { %p393_p0 = pneg %p392_p10 }
  0x37   : > { %p398_p8 = pnand %p397_p7, %p393_p0 }
  0x39   : > { %401 = shalt.err (!%p398_p8)
}
  0x3a   : > { %s402_s7 = scalar_lea.vmem %s649_s24, 128  ;;  %s526_s25 = smov [#allocation4]  }
  0x3b   : > { %p403_p12 = scmp.ne.s32.totalorder %s649_s24, %s402_s7  ;;  %s407_s26 = sshll.u32 %s526_s25, 4  ;;  %s408_s26 = int_to_ptr.vmem [resolvable:$false] %s407_s26 }
  0x3c   : > { %s409_s27 = scalar_lea.vmem %s408_s26, 256  ;;  %p410_p10 = scmp.lt.s32.totalorder %s649_s24, %s408_s26 }
  0x3d   : > { %p405_p13 = pnand %p403_p12, %p391_p2  ;;  %p411_p11 = scmp.lt.s32.totalorder %s409_s27, %s402_s7 }
  0x3f   : > { %p406_p1 = pneg %p405_p13  ;;  %p412_p5 = por %p411_p11, %p410_p10 }
  0x41   : > { %p413_p9 = pnand %p412_p5, %p406_p1 }
  0x43   : > { %416 = shalt.err (!%p413_p9)
}
  0x44   : > { %300 = dma.hbm_to_vmem [thread:$0]  (!%p637_p6), %s127_s3, 128, %s649_s24, %s115_s5  }
  0x45   : > { %p737_p0 = scmp.ne.s32.totalorder %s736_s22, 0 }
  0x46   : > { %s140_s21 = sand.u32 (!%p737_p0), 1, %s507_s16   ;;  %p738_p12 = scmp.ne.s32.totalorder (!%p737_p0), %s732_s28, 0 }
  0x47   : > { %138 = sbr.rel (%p737_p0) target bundleno = 127 (0x7f), region = 24  ;;  %s281_s29 = sshll.u32 (!%p737_p0), %s140_s21, 3 }
  0x48   : > { %s141_s11 = scalar_lea.sflag (!%p737_p0), [#allocation5], %s140_s21  ;;  %s144_s15 = scalar_lea.vmem (!%p737_p0), [#allocation4], %s281_s29 }
  0x4c   : > { %482 = dma.done.wait (%p738_p12), %s141_s11, 128  }
  0x4d   : > { %484 = vsyncadd (%p738_p12), %s141_s11, 4294967168  ;;  %s160_s9 = sand.u32 1, %s495_s13   ;;  %s166_s10 = sld [smem:[#allocation3 + %s515_s0]] }
  0x4e   : > { %s282_s23 = sshll.u32 %s160_s9, 3 }
  0x4f   : > { %s162_s24 = scalar_lea.vmem [#allocation7], %s282_s23 }
  0x53   : > { %p283_p5 = scmp.ne.s32.totalorder %s166_s10, 0 }
  0x55   : > { %170 = sbr.rel (%p283_p5) target bundleno = 92 (0x5c), region = 32 }
  0x5a   : > { %v527_v0 = vmov 0.0  }
  0x5b   : > { %171 = vst [vmem:[%s162_s24] sm:$0xff] %v527_v0 }
  0x5c PF: > { %p284_p11 = scmp.eq.s32.totalorder %s166_s10, 0 }
  0x5e   : > { %175 = sbr.rel (%p284_p11) target bundleno = 103 (0x67), region = 36 }
  0x63   : > { %v176_v1 = vld [vmem:[%s144_s15] sm:$0xff] }
  0x64   : > { %v177_v2 = vmul.f32 1.25, %v176_v1 }
  0x66   : > { %178 = vst [vmem:[%s162_s24] sm:$0xff] %v177_v2 }
  0x67 PF: > { %s286_s28 = sshll.u32 %s515_s0, 7  ;;  %s194_s20 = sshll.u32 %s162_s24, 4  ;;  %s195_s20 = int_to_ptr.vmem [resolvable:$true] %s194_s20 }
  0x68   : > { %s192_s5 = scalar_lea.hbm %s727_s2, %s286_s28  ;;  %s180_s7 = scalar_lea.sflag [#allocation6], %s160_s9 }
  0x69   : > { %s417_s25 = scalar_lea.vmem %s195_s20, 128  ;;  %p739_p6 = scmp.ne.s32.totalorder %s733_s4, 0 }
  0x6a   : > { %p418_p13 = scmp.ne.s32.totalorder %s195_s20, %s417_s25  ;;  %s528_s26 = smov [#allocation7]  }
  0x6b   : > { %s421_s27 = sshll.u32 %s528_s26, 4  ;;  %s422_s27 = int_to_ptr.vmem [resolvable:$false] %s421_s27 }
  0x6c   : > { %p419_p9 = pnand %p418_p13, %p739_p6  ;;  %s423_s21 = scalar_lea.vmem %s422_s27, 256 }
  0x6d   : > { %p424_p3 = scmp.lt.s32.totalorder %s195_s20, %s422_s27  ;;  %p425_p4 = scmp.lt.s32.totalorder %s423_s21, %s417_s25 }
  0x6e   : > { %p420_p2 = pneg %p419_p9 }
  0x6f   : > { %p426_p7 = por %p425_p4, %p424_p3 }
  0x71   : > { %p427_p8 = pnand %p426_p7, %p420_p2 }
  0x73   : > { %430 = shalt.err (!%p427_p8)
}
  0x74   : > { %s431_s0 = scalar_lea.hbm %s192_s5, 128  ;;  %s435_s15 = scalar_lea.hbm %s727_s2, 256 }
  0x75   : > { %p432_p1 = scmp.ne.s32.totalorder %s192_s5, %s431_s0  ;;  %p436_p12 = scmp.lt.s32.totalorder %s192_s5, %s727_s2 }
  0x76   : > { %p437_p5 = scmp.lt.s32.totalorder %s435_s15, %s431_s0 }
  0x77   : > { %p433_p10 = pnand %p432_p1, %p739_p6 }
  0x78   : > { %p438_p11 = por %p437_p5, %p436_p12 }
  0x79   : > { %p434_p0 = pneg %p433_p10 }
  0x7b   : > { %p439_p13 = pnand %p438_p11, %p434_p0 }
  0x7d   : > { %442 = shalt.err (!%p439_p13)
}
  0x7e   : > { %293 = dma.vmem_to_hbm [thread:$0]  (%p739_p6), %s195_s20, 128, %s192_s5, %s180_s7  }
  0x7f PF: > { %s206_s23 = sand.u32 1, %s491_s12   ;;  %p740_p9 = scmp.ne.s32.totalorder %s734_s6, 0 }
  0x80   : > { %p741_p2 = scmp.ge.s32.totalorder %s523_s19, 2  ;;  %s207_s24 = scalar_lea.sflag [#allocation6], %s206_s23 }
  0x82   : > { %p302_p3 = pnand %p741_p2, %p740_p9 }
  0x84   : > { %p303_p4 = pneg %p302_p3 }
  0x86   : > { %486 = dma.done.wait (%p303_p4), %s207_s24, 128  }
  0x87   : > { %488 = vsyncadd (%p303_p4), %s207_s24, 4294967168  ;;  %s22_s19 = sadd.s32 1, %s523_s19   ;;  %s742_s4 = sld [smem:[#allocation13_spill]] }
  0x88   : > { %p19_p7 = scmp.ge.s32.totalorder %s22_s19, 4   ;;  %s743_s12 = smov %s495_s13 }
  0x89   : > { %s744_s13 = smov %s499_s14  ;;  %s745_s14 = smov %s613_s30 }
  0x8a   : > { %s746_s15 = smov %s507_s16  ;;  %s747_s16 = smov %s511_s17 }
  0x8b   : > { %s748_s17 = smov %s635_s8  ;;  %s749_s0 = smov %s519_s18 }
  0x8c   :  { %21 = sbr.rel (!%p19_p7) target bundleno = 13 (0xd), region = 77 }
  0x8d   : > { %s750_s18 = smov %s742_s4 }
  0x91   :  { %212 = vsyncpa [#allocation5], 1 }
  0x92   :  { %214 = vsyncpa [#allocation5 + $0x1], 1 }
  0x93   :  { %215 = vsyncpa [#allocation6], 1 }
  0x94   :  { %217 = vsyncpa [#allocation6 + $0x1], 1 }

</bundles_post_ra>
